<compile_context>
chip_gen: v6e
topology: v6e:2x2x1
jax: 0.10.0
libtpu: 0.0.40
codegen_flags: <defaults>
</compile_context>

<pallas_src>
import jax
import jax.numpy as jnp
from jax.experimental import pallas as pl
from jax.experimental.pallas import tpu as pltpu

_TARGET_TILE_BYTES = 8 * 1024 * 1024    # per-block size for large arrays
_MIN_TILE_BYTES = 1 * 1024 * 1024       # never shrink below this for step count
_VMEM_LIMIT_BYTES = 40 * 1024 * 1024    # (2 in + 2 out) x 8 MiB tiles = 32 MiB
_DEFAULT_BYPASS_BYTES = 1 * 1024 * 1024  # below this, skip the kernel entirely


def _identity_copy_kernel(r_ref, o_ref):
    # Identity pass-through: copy the relevance tile unchanged.
    o_ref[...] = r_ref[...]


def _hbm_copy_kernel(r_hbm, o_hbm, sem):
    # Direct HBM->HBM DMA of the whole flat array: no VMEM staging, no
    # (8, 128) layout constraints.  Used only for the rare ragged fallback.
    cp = pltpu.make_async_copy(r_hbm, o_hbm, sem)
    cp.start()
    cp.wait()


def _cdiv(a: int, b: int) -> int:
    return -(-a // b)


def _round_up(x: int, m: int) -> int:
    return _cdiv(x, m) * m


def relevance_propagation_identity(
    a: jax.Array,
    r: jax.Array,
    *,
    min_pallas_bytes: int = _DEFAULT_BYPASS_BYTES,
    donate: bool = False,
) -> jax.Array:
    """Pass relevance scores through unchanged (identity).

    `a` is accepted to match the PyTorch module signature but is never read
    (streaming it would ~1.5x the HBM traffic for zero benefit).

    min_pallas_bytes: below this size the function returns `r` directly
        (bit-exact identity, zero HBM traffic).  Set to 0 to force the kernel.
    donate: only set True if the caller actually donates `r` at the jit
        boundary (jax.jit(..., donate_argnums=...)); otherwise aliasing makes
        XLA insert a defensive copy and doubles wall time.
    """
    del a  # module semantics: `a` is ignored entirely

    orig_shape = r.shape
    total = int(r.size)
    itemsize = jnp.dtype(r.dtype).itemsize
    total_bytes = total * itemsize

    if total == 0 or total_bytes < min_pallas_bytes:
        # Identity semantics: returning `r` is exact and free.
        return r

    alias = {0: 0} if donate else {}

    # Widest lane-dense layout that is a *free* (view-only) reshape.
    lane = next((c for c in (1024, 512, 256, 128) if total % c == 0), None)

    if lane is None:
        # Ragged flat size: single HBM->HBM DMA copy of the whole array.
        flat = r.reshape(total)
        out = pl.pallas_call(
            _hbm_copy_kernel,
            out_shape=jax.ShapeDtypeStruct((total,), r.dtype),
            in_specs=[pl.BlockSpec(memory_space=pl.ANY)],
            out_specs=pl.BlockSpec(memory_space=pl.ANY),
            scratch_shapes=[pltpu.SemaphoreType.DMA],
        )(flat)
        return out.reshape(orig_shape)

    rows = total // lane
    # Minimum sublane multiple for the dtype (f32 -> 8, bf16 -> 16, int8 -> 32).
    sublane = max(8, 32 // max(itemsize, 1))
    r2d = r.reshape(rows, lane)  # free view, row-major flatten

    if rows <= sublane:
        # Tiny array: one full-dim block (always layout-legal).
        tile_rows = rows
    else:
        # Minimum steps so each tile is at most ~8 MiB (amortizes the ~0.35 us
        # per-step overhead to a few % even at v7x's 3.2 TB/s HBM).
        steps = _cdiv(total_bytes, _TARGET_TILE_BYTES)
        if total_bytes >= 4 * _MIN_TILE_BYTES:
            # Large enough: target an even step count >= 4 so both v7x TCs get
            # >= 2 pipelined steps each (input prefetch overlaps output
            # writeback) with balanced sharding, while tiles stay >= ~1-2 MiB.
            steps = max(steps, 4)
            steps += steps % 2
        tile_rows = min(rows, _round_up(_cdiv(rows, steps), sublane))

    grid = (_cdiv(rows, tile_rows),)

    out2d = pl.pallas_call(
        _identity_copy_kernel,
        out_shape=jax.ShapeDtypeStruct((rows, lane), r.dtype),
        grid_spec=pltpu.PrefetchScalarGridSpec(
            num_scalar_prefetch=0,
            grid=grid,
            in_specs=[pl.BlockSpec((tile_rows, lane), lambda i: (i, 0))],
            out_specs=pl.BlockSpec((tile_rows, lane), lambda i: (i, 0)),
        ),
        compiler_params=pltpu.CompilerParams(
            dimension_semantics=("parallel",),
            vmem_limit_bytes=_VMEM_LIMIT_BYTES,
        ),
        input_output_aliases=alias,
    )(r2d)

    return out2d.reshape(orig_shape)


if __name__ == "__main__":
    key = jax.random.PRNGKey(0)
    ka, kr, kq = jax.random.split(key, 3)
    # NCHW, consistent with PyTorch conv-style activations/relevances.
    a = jax.random.normal(ka, (2, 4, 16, 16), dtype=jnp.float32)
    r = jax.random.normal(kr, (2, 4, 16, 16), dtype=jnp.float32)

    # Force the Pallas tiled path (the demo tensor is only 8 KiB, which the
    # default bypass threshold would short-circuit).
    out = relevance_propagation_identity(a, r, min_pallas_bytes=0)
    out = jax.block_until_ready(out)
    assert out.shape == r.shape and out.dtype == r.dtype
    assert bool(jnp.all(out == r))

    # Ragged fallback (105 elements, not a multiple of 128): HBM->HBM DMA path.
    r_rag = jax.random.normal(kq, (3, 5, 7), dtype=jnp.float32)
    out_rag = relevance_propagation_identity(r_rag, r_rag, min_pallas_bytes=0)
    out_rag = jax.block_until_ready(out_rag)
    assert out_rag.shape == r_rag.shape and out_rag.dtype == r_rag.dtype
    assert bool(jnp.all(out_rag == r_rag))

    # Default behavior: small inputs skip the kernel entirely (pure identity).
    out_fast = relevance_propagation_identity(a, r)
    assert out_fast is r

    print("KERNEL_OK")
</pallas_src>

<mosaic_0001>
module attributes {stable_mosaic.version = 11 : i64} {
  func.func @_identity_copy_kernel(%arg0: i32, %arg1: memref<2x1024xf32, #tpu.memory_space<vmem>>, %arg2: memref<2x1024xf32, #tpu.memory_space<vmem>>) attributes {dimension_semantics = [#tpu.dimension_semantics<parallel>], iteration_bounds = array<i64: 1>, scalar_prefetch = 0 : i64, scratch_operands = 0 : i64, tpu.core_type = #tpu.core_type<tc>, window_params = [{transform_indices = @transform_0, window_bounds = array<i64: 2, 1024>}, {transform_indices = @transform_1, window_bounds = array<i64: 2, 1024>}]} {
    %c0 = arith.constant 0 : index
    %c0_0 = arith.constant 0 : index
    %0 = vector.load %arg1[%c0, %c0_0] : memref<2x1024xf32, #tpu.memory_space<vmem>>, vector<2x1024xf32>
    %c0_1 = arith.constant 0 : index
    %c0_2 = arith.constant 0 : index
    %1 = vector.load %arg2[%c0_1, %c0_2] : memref<2x1024xf32, #tpu.memory_space<vmem>>, vector<2x1024xf32>
    tpu.vector_store %arg2[%c0_1, %c0_2], %0 {strides = array<i32>} : memref<2x1024xf32, #tpu.memory_space<vmem>>, vector<2x1024xf32>,
    return
  }
  func.func @transform_0(%arg0: i32) -> (i32, i32) {
    %c0_i32 = arith.constant 0 : i32
    %c0_i32_0 = arith.constant 0 : i32
    return %arg0, %c0_i32 : i32, i32
  }
  func.func @transform_1(%arg0: i32) -> (i32, i32) {
    %c0_i32 = arith.constant 0 : i32
    %c0_i32_0 = arith.constant 0 : i32
    return %arg0, %c0_i32 : i32, i32
  }
}

</mosaic_0001>

<bundles_post_ra>
// kernel: tpu_custom_call.1
= control target key start
LH: loop header
LB: loop body
LE: loop exit
PB: predicated region body
PF: predicated region fallthrough
CT: control target
= control target key end

     0   :  { %6 = vsyncpa [#allocation3], 0  ;;  %s104_s0 = inlined_call_operand.hbm [shape: f32[2,1024], index: 0, kind: input, shape index: {}]   ;;  %s105_s1 = inlined_call_operand.hbm [shape: f32[2,1024], index: 1, kind: output, shape index: {}]  }
   0x1   :  { %7 = vsyncpa [#allocation4], 0  ;;  %s86_s6 = smov [#allocation2]  }
   0x2   :  { %s14_s7 = sshll.u32 %s86_s6, 4  ;;  %s15_s7 = int_to_ptr.vmem [resolvable:$true] %s14_s7 }
   0x3   :  { %s50_s8 = scalar_lea.vmem %s15_s7, 256  ;;  %p55_p1 = scmp.lt.s32.totalorder %s15_s7, %s15_s7 }
   0x4   :  { %p51_p0 = scmp.ne.s32.totalorder %s15_s7, %s50_s8  ;;  %p56_p2 = scmp.lt.s32.totalorder %s50_s8, %s50_s8 }
   0x6   :  { %p57_p3 = por %p56_p2, %p55_p1 }
   0x8   :  { %p58_p4 = pnand %p57_p3, %p51_p0 }
   0xa   :  { %61 = shalt.err (!%p58_p4)
}
   0xb   :  { %17 = dma.hbm_to_vmem [thread:$0]  %s104_s0, 256, %s15_s7, [#allocation3]  }
   0xc   :  { %82 = dma.done.wait [#allocation3], 256  }
   0xd   :  { %83 = vsyncadd [#allocation3], 4294967040  ;;  %s87_s11 = smov [#allocation5]   ;;  %v21_v0 = vld [vmem:[#allocation2] sm:$0xff]  ;;  %v22_v1 = vld [vmem:[#allocation2 + $0x8] sm:$0xff] }
   0xe   :  { %s31_s12 = sshll.u32 %s87_s11, 4  ;;  %23 = vst [vmem:[#allocation5] sm:$0xff] %v21_v0  ;;  %24 = vst [vmem:[#allocation5 + $0x8] sm:$0xff] %v22_v1  ;;  %s32_s12 = int_to_ptr.vmem [resolvable:$true] %s31_s12 }
   0xf   :  { %s62_s13 = scalar_lea.vmem %s32_s12, 256  ;;  %p67_p6 = scmp.lt.s32.totalorder %s32_s12, %s32_s12 }
  0x10   :  { %p63_p5 = scmp.ne.s32.totalorder %s32_s12, %s62_s13  ;;  %p68_p7 = scmp.lt.s32.totalorder %s62_s13, %s62_s13 }
  0x12   :  { %p69_p8 = por %p68_p7, %p67_p6 }
  0x14   :  { %p70_p9 = pnand %p69_p8, %p63_p5 }
  0x16   :  { %73 = shalt.err (!%p70_p9)
}
  0x17   :  { %34 = dma.vmem_to_hbm [thread:$0]  %s32_s12, 256, %s105_s1, [#allocation4]  }
  0x18   :  { %84 = dma.done.wait [#allocation4], 256  }
  0x19   :  { %85 = vsyncadd [#allocation4], 4294967040 }
  0x1a   :  { %38 = vsyncpa [#allocation3], 1 }
  0x1b   :  { %39 = vsyncpa [#allocation4], 1 }

</bundles_post_ra>
